<compile_context>
chip_gen: v7x
topology: tpu7x:2x2x1
jax: 0.10.0
libtpu: 0.0.40
codegen_flags: <defaults>
</compile_context>

<pallas_src>
import functools

import jax
import jax.numpy as jnp
from jax import lax
from jax.experimental import pallas as pl
from jax.experimental.pallas import tpu as pltpu


# ----------------------------------------------------------------------------
# Pallas kernel: fused conv-matmul -> LayerNorm -> leaky -> channel sums -> leaky
# ----------------------------------------------------------------------------
def _cnn_gen_kernel(p_ref, w_ref, gb_ref, slope_ref, cw_ref, o_ref):
    eps = 1e-5
    p = p_ref[0]                       # (CKP, HW) bf16 patches (+ ones row for bias)
    w = w_ref[...]                     # (16, CKP) bf16 fused block-diagonal weight
    # Both convs + biases in one MXU matmul, f32 accumulation.
    y = jnp.dot(w, p, preferred_element_type=jnp.float32)      # (16, HW) f32

    # LayerNorm over the (H, W) == HW lane axis, per channel row.
    mean = jnp.mean(y, axis=1, keepdims=True)                  # (16, 1)
    var = jnp.mean((y - mean) ** 2, axis=1, keepdims=True)     # (16, 1)
    yn = (y - mean) * lax.rsqrt(var + eps)
    gb = gb_ref[...]                                           # (2, HW) f32
    yn = yn * gb[0:1, :] + gb[1:2, :]

    # Per-channel leaky_relu (slope 0.5 for conv1 rows, 0.05 for conv2 rows).
    slope = slope_ref[...]                                     # (16, 1) f32
    ya = jnp.where(yn >= 0, yn, slope * yn)

    # Channel-weighted sum (0.25 x4 / 0.125 x8; padding rows weighted 0).
    cw = cw_ref[...]                                           # (16, 1) f32
    x = jnp.sum(ya * cw, axis=0, keepdims=True)                # (1, HW)

    # Final leaky_relu(., 0.5), lane-dense store.
    o_ref[0] = jnp.where(x >= 0, x, 0.5 * x)                   # (1, HW)


# ----------------------------------------------------------------------------
# Wrapper glue
# ----------------------------------------------------------------------------
def _round_up(x, m):
    return ((x + m - 1) // m) * m


def _im2col_cm(x, K, P):
    """x: (B, H, W) -> channel-major patches (B, K*K, H*W); row = ky*K + kx."""
    B, H, W = x.shape
    xp = jnp.pad(x, ((0, 0), (P, P), (P, P)))
    rows = [xp[:, ky:ky + H, kx:kx + W].reshape(B, 1, H * W)
            for ky in range(K) for kx in range(K)]
    return jnp.concatenate(rows, axis=1)


def _build_kernel_operands(params, func_matrix):
    """Fused patch tensor + fused weight + small per-channel params."""
    B, H, W = func_matrix.shape
    HW = H * W
    f = func_matrix.astype(jnp.float32)

    K1, P1, C1 = 15, 7, 4
    K2, P2, C2 = 5, 2, 8
    n1, n2 = K1 * K1, K2 * K2                       # 225, 25
    ckp = _round_up(n1 + n2 + 1, 128)               # 256 (ones row for the bias)
    cout = 16                                       # 4 + 4(pad) + 8 channels

    p1 = _im2col_cm(f, K1, P1)                      # (B, 225, HW)
    p2 = _im2col_cm(f, K2, P2)                      # (B,  25, HW)
    ones_row = jnp.ones((B, 1, HW), jnp.float32)
    pad_rows = jnp.zeros((B, ckp - (n1 + n2 + 1), HW), jnp.float32)
    p = jnp.concatenate([p1, p2, ones_row, pad_rows], axis=1).astype(jnp.bfloat16)

    # Exact channel fold (both input channels are identical copies of f).
    w1f = params["conv1_w"].sum(axis=1).reshape(C1, n1)
    w2f = params["conv2_w"].sum(axis=1).reshape(C2, n2)
    w_all = jnp.zeros((cout, ckp), jnp.float32)
    w_all = w_all.at[0:4, 0:n1].set(w1f)
    w_all = w_all.at[8:16, n1:n1 + n2].set(w2f)
    w_all = w_all.at[0:4, n1 + n2].set(params["conv1_b"])      # bias via ones row
    w_all = w_all.at[8:16, n1 + n2].set(params["conv2_b"])
    w_all = w_all.astype(jnp.bfloat16)

    gb = jnp.stack([params["ln_gamma"].reshape(HW),
                    params["ln_beta"].reshape(HW)], axis=0).astype(jnp.float32)
    slope = jnp.concatenate([jnp.full((4,), 0.5, jnp.float32),
                             jnp.ones((4,), jnp.float32),
                             jnp.full((8,), 0.05, jnp.float32)]).reshape(cout, 1)
    cw = jnp.concatenate([params["weight1"].astype(jnp.float32),
                          jnp.zeros((4,), jnp.float32),
                          params["weight2"].astype(jnp.float32)]).reshape(cout, 1)
    return p, w_all, gb, slope, cw


def cnn_generator1_forward(params, topo, func_matrix, batchSize, isTest=False):
    # topo / batchSize accepted for signature fidelity; unused by the PyTorch forward.
    del topo, batchSize
    B, H, W = func_matrix.shape
    HW = H * W

    p, w_all, gb, slope, cw = _build_kernel_operands(params, func_matrix)
    ckp = p.shape[1]
    cout = w_all.shape[0]

    out = pl.pallas_call(
        _cnn_gen_kernel,
        out_shape=jax.ShapeDtypeStruct((B, 1, HW), jnp.float32),
        grid_spec=pltpu.PrefetchScalarGridSpec(
            num_scalar_prefetch=0,
            grid=(B,),
            in_specs=[
                pl.BlockSpec((1, ckp, HW), lambda b: (b, 0, 0)),
                pl.BlockSpec((cout, ckp), lambda b: (0, 0)),
                pl.BlockSpec((2, HW), lambda b: (0, 0)),
                pl.BlockSpec((cout, 1), lambda b: (0, 0)),
                pl.BlockSpec((cout, 1), lambda b: (0, 0)),
            ],
            out_specs=pl.BlockSpec((1, 1, HW), lambda b: (b, 0, 0)),
        ),
        compiler_params=pltpu.CompilerParams(
            dimension_semantics=("parallel",),
            vmem_limit_bytes=32 * 1024 * 1024,
        ),
    )(p, w_all, gb, slope, cw)

    y = out.reshape(B, H, W)
    # outputs = outputs + transpose(outputs, 1, 2): tiny fused XLA op (no extra kernel).
    outputs = y + jnp.swapaxes(y, 1, 2)

    # TODO(synk): like torch .squeeze(), the returned rank depends on B/H/W == 1.
    if isTest is True:
        return jnp.squeeze(outputs)[None]
    return jnp.squeeze(outputs)


# ----------------------------------------------------------------------------
# Deterministic parameter init (mirrors the shapes from __init__)
# ----------------------------------------------------------------------------
def init_params(key, in_feature):
    k1, k2, k3, k4 = jax.random.split(key, 4)
    fan1 = 2 * 15 * 15
    fan2 = 2 * 5 * 5
    bound1 = 1.0 / jnp.sqrt(fan1)
    bound2 = 1.0 / jnp.sqrt(fan2)
    return {
        "conv1_w": jax.random.uniform(k1, (4, 2, 15, 15), jnp.float32, -bound1, bound1),
        "conv1_b": jax.random.uniform(k2, (4,), jnp.float32, -bound1, bound1),
        "conv2_w": jax.random.uniform(k3, (8, 2, 5, 5), jnp.float32, -bound2, bound2),
        "conv2_b": jax.random.uniform(k4, (8,), jnp.float32, -bound2, bound2),
        "ln_gamma": jnp.ones((in_feature, in_feature), jnp.float32),
        "ln_beta": jnp.zeros((in_feature, in_feature), jnp.float32),
        "weight1": jnp.array([0.25, 0.25, 0.25, 0.25], jnp.float32),
        "weight2": jnp.array([0.125] * 8, jnp.float32),
    }


# ----------------------------------------------------------------------------
# References
# ----------------------------------------------------------------------------
def reference_forward(params, func_matrix):
    """Pure f32 transcription of the PyTorch module (lax.conv, duplicated channels)."""
    x0 = jnp.stack([func_matrix, func_matrix], axis=1).astype(jnp.float32)

    def conv(x, w, b, pad):
        out = lax.conv_general_dilated(
            x, w, (1, 1), ((pad, pad), (pad, pad)),
            dimension_numbers=("NCHW", "OIHW", "NCHW"),
            precision=lax.Precision.HIGHEST)
        return out + b[None, :, None, None]

    def ln(x, gamma, beta, eps=1e-5):
        mean = x.mean(axis=(-2, -1), keepdims=True)
        var = ((x - mean) ** 2).mean(axis=(-2, -1), keepdims=True)
        return (x - mean) * lax.rsqrt(var + eps) * gamma + beta

    def leaky(x, s):
        return jnp.where(x >= 0, x, s * x)

    x1 = conv(x0, params["conv1_w"], params["conv1_b"], 7)
    x1 = leaky(ln(x1, params["ln_gamma"], params["ln_beta"]), 0.5)
    x1 = jnp.einsum("c,bchw->bhw", params["weight1"], x1)
    x2 = conv(x0, params["conv2_w"], params["conv2_b"], 2)
    x2 = leaky(ln(x2, params["ln_gamma"], params["ln_beta"]), 0.05)
    x2 = jnp.einsum("c,bchw->bhw", params["weight2"], x2)
    out = leaky(x1 + x2, 0.5)
    return out + jnp.swapaxes(out, 1, 2)


def reference_matched(params, func_matrix):
    """Quantization-matched reference: same folded bf16 operands as the kernel, plain JAX.
    Validates the Pallas kernel tightly (only accumulation-order differences remain)."""
    B, H, W = func_matrix.shape
    p, w_all, gb, slope, cw = _build_kernel_operands(params, func_matrix)
    pq = p.astype(jnp.float32)
    wq = w_all.astype(jnp.float32)
    y = jnp.einsum("ok,bkn->bon", wq, pq, precision=lax.Precision.HIGHEST)
    mean = y.mean(axis=-1, keepdims=True)
    var = ((y - mean) ** 2).mean(axis=-1, keepdims=True)
    yn = (y - mean) * lax.rsqrt(var + 1e-5)
    yn = yn * gb[0][None, None, :] + gb[1][None, None, :]
    ya = jnp.where(yn >= 0, yn, slope.reshape(1, -1, 1) * yn)
    x = jnp.sum(ya * cw.reshape(1, -1, 1), axis=1)
    x = jnp.where(x >= 0, x, 0.5 * x)
    z = x.reshape(B, H, W)
    return z + jnp.swapaxes(z, 1, 2)


# ----------------------------------------------------------------------------
if __name__ == "__main__":
    B = 2
    in_feature = 16          # H == W == in_feature (LayerNorm([in_feature, in_feature]))

    key = jax.random.PRNGKey(0)
    k_param, k_topo, k_func = jax.random.split(key, 3)

    params = init_params(k_param, in_feature)
    topo = jax.random.normal(k_topo, (B, in_feature, in_feature), jnp.float32)   # unused
    func_matrix = jax.random.normal(k_func, (B, in_feature, in_feature), jnp.float32)

    fwd = jax.jit(functools.partial(cnn_generator1_forward, isTest=False))
    out = fwd(params, topo, func_matrix, B)
    out = jax.block_until_ready(out)

    # (1) Tight check against the quantization-matched reference (same bf16 operands):
    #     validates the kernel's matmul / LayerNorm / leaky / weighted-sum / sym exactly.
    ref_m = reference_matched(params, func_matrix)
    assert out.shape == ref_m.shape, (out.shape, ref_m.shape)
    err_m = float(jnp.max(jnp.abs(out - ref_m)))
    assert jnp.allclose(out, ref_m, rtol=2e-3, atol=2e-3), err_m

    # (2) End-to-end check against the f32 module semantics; the only deviation is the
    #     bf16 quantization of the patch/weight streams (validated exactly above).
    ref = reference_forward(params, func_matrix)
    assert out.shape == ref.shape, (out.shape, ref.shape)
    err = float(jnp.max(jnp.abs(out - ref)))
    assert jnp.allclose(out, ref, rtol=2.5e-2, atol=2.5e-2), err

    print("KERNEL_OK")
</pallas_src>

<mosaic_0001>
module attributes {stable_mosaic.version = 11 : i64} {
  func.func @_cnn_gen_kernel(%arg0: i32, %arg1: memref<1x256x256xbf16, #tpu.memory_space<vmem>>, %arg2: memref<16x256xbf16, #tpu.memory_space<vmem>>, %arg3: memref<2x256xf32, #tpu.memory_space<vmem>>, %arg4: memref<16x1xf32, #tpu.memory_space<vmem>>, %arg5: memref<16x1xf32, #tpu.memory_space<vmem>>, %arg6: memref<1x1x256xf32, #tpu.memory_space<vmem>>) attributes {dimension_semantics = [#tpu.dimension_semantics<parallel>], iteration_bounds = array<i64: 2>, scalar_prefetch = 0 : i64, scratch_operands = 0 : i64, tpu.core_type = #tpu.core_type<tc>, window_params = [{transform_indices = @transform_0, window_bounds = array<i64: 1, 256, 256>}, {pipeline_mode = #tpu.pipeline_mode<synchronous>, transform_indices = @transform_1, window_bounds = array<i64: 16, 256>}, {pipeline_mode = #tpu.pipeline_mode<synchronous>, transform_indices = @transform_2, window_bounds = array<i64: 2, 256>}, {pipeline_mode = #tpu.pipeline_mode<synchronous>, transform_indices = @transform_3, window_bounds = array<i64: 16, 1>}, {pipeline_mode = #tpu.pipeline_mode<synchronous>, transform_indices = @transform_4, window_bounds = array<i64: 16, 1>}, {transform_indices = @transform_5, window_bounds = array<i64: 1, 1, 256>}]} {
    %c0 = arith.constant 0 : index
    %c0_0 = arith.constant 0 : index
    %c0_1 = arith.constant 0 : index
    %0 = vector.load %arg1[%c0, %c0_0, %c0_1] : memref<1x256x256xbf16, #tpu.memory_space<vmem>>, vector<1x256x256xbf16>
    %1 = vector.shape_cast %0 : vector<1x256x256xbf16> to vector<256x256xbf16>
    %c0_2 = arith.constant 0 : index
    %c0_3 = arith.constant 0 : index
    %2 = vector.load %arg2[%c0_2, %c0_3] : memref<16x256xbf16, #tpu.memory_space<vmem>>, vector<16x256xbf16>
    %cst = arith.constant dense<0.000000e+00> : vector<16x256xf32>
    %3 = tpu.matmul %2, %1, %cst {dimension_numbers = #tpu.dot_dimension_numbers<[1], [0], [0], [1], [0, 0, 1, 1], [], []>} : vector<16x256xbf16>, vector<256x256xbf16>, vector<16x256xf32> -> vector<16x256xf32>
    %cst_4 = arith.constant dense<0.000000e+00> : vector<16xf32>
    %4 = vector.multi_reduction <add>, %3, %cst_4 [1] : vector<16x256xf32> to vector<16xf32>
    %5 = vector.shape_cast %4 : vector<16xf32> to vector<16x1xf32>
    %cst_5 = arith.constant 2.560000e+02 : f32
    %6 = vector.broadcast %cst_5 : f32 to vector<16x1xf32>
    %7 = arith.divf %5, %6 : vector<16x1xf32>
    %8 = vector.broadcast %7 : vector<16x1xf32> to vector<16x256xf32>
    %9 = arith.subf %3, %8 : vector<16x256xf32>
    %10 = arith.mulf %9, %9 : vector<16x256xf32>
    %cst_6 = arith.constant dense<0.000000e+00> : vector<16xf32>
    %11 = vector.multi_reduction <add>, %10, %cst_6 [1] : vector<16x256xf32> to vector<16xf32>
    %12 = vector.shape_cast %11 : vector<16xf32> to vector<16x1xf32>
    %cst_7 = arith.constant 2.560000e+02 : f32
    %13 = vector.broadcast %cst_7 : f32 to vector<16x1xf32>
    %14 = arith.divf %12, %13 : vector<16x1xf32>
    %15 = vector.broadcast %7 : vector<16x1xf32> to vector<16x256xf32>
    %16 = arith.subf %3, %15 : vector<16x256xf32>
    %cst_8 = arith.constant 9.99999974E-6 : f32
    %17 = vector.broadcast %cst_8 : f32 to vector<16x1xf32>
    %18 = arith.addf %14, %17 : vector<16x1xf32>
    %19 = math.rsqrt %18 : vector<16x1xf32>
    %20 = vector.broadcast %19 : vector<16x1xf32> to vector<16x256xf32>
    %21 = arith.mulf %16, %20 : vector<16x256xf32>
    %c0_9 = arith.constant 0 : index
    %c0_10 = arith.constant 0 : index
    %22 = vector.load %arg3[%c0_9, %c0_10] : memref<2x256xf32, #tpu.memory_space<vmem>>, vector<2x256xf32>
    %23 = vector.extract_strided_slice %22 {offsets = [0, 0], sizes = [1, 256], strides = [1, 1]} : vector<2x256xf32> to vector<1x256xf32>
    %24 = vector.broadcast %23 : vector<1x256xf32> to vector<16x256xf32>
    %25 = arith.mulf %21, %24 : vector<16x256xf32>
    %26 = vector.extract_strided_slice %22 {offsets = [1, 0], sizes = [1, 256], strides = [1, 1]} : vector<2x256xf32> to vector<1x256xf32>
    %27 = vector.broadcast %26 : vector<1x256xf32> to vector<16x256xf32>
    %28 = arith.addf %25, %27 : vector<16x256xf32>
    %c0_11 = arith.constant 0 : index
    %c0_12 = arith.constant 0 : index
    %29 = vector.load %arg4[%c0_11, %c0_12] : memref<16x1xf32, #tpu.memory_space<vmem>>, vector<16x1xf32>
    %cst_13 = arith.constant 0.000000e+00 : f32
    %30 = vector.broadcast %cst_13 : f32 to vector<16x256xf32>
    %31 = arith.cmpf oge, %28, %30 : vector<16x256xf32>
    %32 = vector.broadcast %29 : vector<16x1xf32> to vector<16x256xf32>
    %33 = arith.mulf %32, %28 : vector<16x256xf32>
    %34 = arith.select %31, %28, %33 : vector<16x256xi1>, vector<16x256xf32>
    %c0_14 = arith.constant 0 : index
    %c0_15 = arith.constant 0 : index
    %35 = vector.load %arg5[%c0_14, %c0_15] : memref<16x1xf32, #tpu.memory_space<vmem>>, vector<16x1xf32>
    %36 = vector.broadcast %35 : vector<16x1xf32> to vector<16x256xf32>
    %37 = arith.mulf %34, %36 : vector<16x256xf32>
    %cst_16 = arith.constant dense<0.000000e+00> : vector<256xf32>
    %38 = vector.multi_reduction <add>, %37, %cst_16 [0] : vector<16x256xf32> to vector<256xf32>
    %39 = vector.shape_cast %38 : vector<256xf32> to vector<1x256xf32>
    %cst_17 = arith.constant 0.000000e+00 : f32
    %40 = vector.broadcast %cst_17 : f32 to vector<1x256xf32>
    %41 = arith.cmpf oge, %39, %40 : vector<1x256xf32>
    %cst_18 = arith.constant 5.000000e-01 : f32
    %42 = vector.broadcast %cst_18 : f32 to vector<1x256xf32>
    %43 = arith.mulf %42, %39 : vector<1x256xf32>
    %44 = arith.select %41, %39, %43 : vector<1x256xi1>, vector<1x256xf32>
    %c0_19 = arith.constant 0 : index
    %c0_20 = arith.constant 0 : index
    %c0_21 = arith.constant 0 : index
    %45 = vector.load %arg6[%c0_19, %c0_20, %c0_21] : memref<1x1x256xf32, #tpu.memory_space<vmem>>, vector<1x1x256xf32>
    %46 = vector.shape_cast %45 : vector<1x1x256xf32> to vector<1x256xf32>
    %47 = vector.shape_cast %44 : vector<1x256xf32> to vector<1x1x256xf32>
    tpu.vector_store %arg6[%c0_19, %c0_20, %c0_21], %47 {strides = array<i32>} : memref<1x1x256xf32, #tpu.memory_space<vmem>>, vector<1x1x256xf32>,
    return
  }
  func.func @transform_0(%arg0: i32) -> (i32, i32, i32) {
    %c0_i32 = arith.constant 0 : i32
    %c0_i32_0 = arith.constant 0 : i32
    %c0_i32_1 = arith.constant 0 : i32
    return %arg0, %c0_i32, %c0_i32_0 : i32, i32, i32
  }
  func.func @transform_1(%arg0: i32) -> (i32, i32) {
    %c0_i32 = arith.constant 0 : i32
    %c0_i32_0 = arith.constant 0 : i32
    %c0_i32_1 = arith.constant 0 : i32
    return %c0_i32, %c0_i32_0 : i32, i32
  }
  func.func @transform_2(%arg0: i32) -> (i32, i32) {
    %c0_i32 = arith.constant 0 : i32
    %c0_i32_0 = arith.constant 0 : i32
    %c0_i32_1 = arith.constant 0 : i32
    return %c0_i32, %c0_i32_0 : i32, i32
  }
  func.func @transform_3(%arg0: i32) -> (i32, i32) {
    %c0_i32 = arith.constant 0 : i32
    %c0_i32_0 = arith.constant 0 : i32
    %c0_i32_1 = arith.constant 0 : i32
    return %c0_i32, %c0_i32_0 : i32, i32
  }
  func.func @transform_4(%arg0: i32) -> (i32, i32) {
    %c0_i32 = arith.constant 0 : i32
    %c0_i32_0 = arith.constant 0 : i32
    %c0_i32_1 = arith.constant 0 : i32
    return %c0_i32, %c0_i32_0 : i32, i32
  }
  func.func @transform_5(%arg0: i32) -> (i32, i32, i32) {
    %c0_i32 = arith.constant 0 : i32
    %c0_i32_0 = arith.constant 0 : i32
    %c0_i32_1 = arith.constant 0 : i32
    return %arg0, %c0_i32, %c0_i32_0 : i32, i32, i32
  }
}

</mosaic_0001>

<bundles_post_ra>
// kernel: cnn_generator1_forward.1
= control target key start
LH: loop header
LB: loop body
LE: loop exit
PB: predicated region body
PF: predicated region fallthrough
CT: control target
= control target key end

     0   :  { %s837_s18 = smov 0   ;;  %s922_s0 = inlined_call_operand.vmem [shape: bf16[2,256,256], index: 0, kind: input, shape index: {}]   ;;  %s923_s1 = inlined_call_operand.vmem [shape: bf16[16,256], index: 1, kind: input, shape index: {}]   ;;  %s924_s2 = inlined_call_operand.vmem [shape: f32[2,256], index: 2, kind: input, shape index: {}]   ;;  %s925_s3 = inlined_call_operand.vmem [shape: f32[16,1], index: 3, kind: input, shape index: {}]   ;;  %s926_s4 = inlined_call_operand.vmem [shape: f32[16,1], index: 4, kind: input, shape index: {}]   ;;  %s927_s5 = inlined_call_operand.vmem [shape: f32[2,1,256], index: 5, kind: output, shape index: {}]  }
   0x1 LB: > { %s685_s19 = sadd.s32 4294967295, %s803_s18   ;;  %p689_p0 = scmp.ge.s32.totalorder %s803_s18, 1  ;;  %s803_s18 = sphi %s837_s18, %s15_s18  }
   0x2   : > { %p187_p1 = scmp.lt.s32.totalorder %s803_s18, 3 }
   0x4   : > { %p188_p2 = pnand %p689_p0, %p187_p1 }
   0x5   : > { %p214_p3 = scmp.lt.s32.totalorder (!%p188_p2), %s685_s19, 1  ;;  %v792_v0 = vld [vmem:[%s923_s1 + $0x4] ss:$8 sps:$4 sm:$0xff] (!%p188_p2)   ;;  %v790_v33 = vld [vmem:[%s923_s1] ss:$8 sps:$4 sm:$0xff] (!%p188_p2)   ;;  %v805_v35 = vmov (!%p188_p2), 0   ;;  %v505_v61 = vlaneseq (!%p188_p2) }
   0x6   : > { %191 = sbr.rel (%p188_p2) target bundleno = 642 (0x282), region = 40  ;;  %459 = vmatprep.mubr.bf16.mxu0 (!%p188_p2), %v792_v0  ;;  %v550_v34 = vld [vmem:[%s925_s3 + $0x8] sm:$0xff] (!%p188_p2)  ;;  %741 = vset.pattern.permute.xlu1 (!%p188_p2), %v805_v35  ;;  %v573_v36 = vld [vmem:[%s926_s4] sm:$0xff] (!%p188_p2) }
   0x7   : > { %740 = vset.pattern.permute.xlu0 (!%p188_p2), %v805_v35  ;;  %562 = vperm.xlu1 (!%p188_p2), %741, %v550_v34   ;;  %v549_v43 = vld [vmem:[%s925_s3] sm:$0xff] (!%p188_p2)  ;;  %v574_v58 = vld [vmem:[%s926_s4 + $0x8] sm:$0xff] (!%p188_p2)  ;;  %v904_v0 = vshrl.u32 (!%p188_p2), %v505_v61, 7  ;;  %vm629_vm6 = vcmp.lt.s32.totalorder (!%p188_p2), %v505_v61, 256 }
   0xb   : > { %577 = vperm.xlu1 (!%p188_p2), %741, %v573_v36  }
   0xd   : > { %s929_s19 = smov (!%p214_p3, %s685_s19), 1 }
   0xe   : > { %s729_s22 = sshll.u32 %s929_s19, 8  ;;  %s692_s13 = sshll.u32 %s929_s19, 1 }
   0xf   : > { %s854_s25 = scalar_lea.vmem %s922_s0, %s729_s22  ;;  %s222_s16 = scalar_lea.vmem %s927_s5, %s692_s13 }
  0x10   : > { %v742_v1 = vld [vmem:[%s854_s25 + $0x4] ss:$8 sps:$4 sm:$0xff]   ;;  %v744_v2 = vld [vmem:[%s854_s25] ss:$8 sps:$4 sm:$0xff]   ;;  %v745_v3 = vld [vmem:[%s854_s25 + $0x14] ss:$8 sps:$4 sm:$0xff]  }
  0x11   : > { %427 = vmatprep.subr.bf16.mxu0 %v742_v1  ;;  %v747_v4 = vld [vmem:[%s854_s25 + $0x10] ss:$8 sps:$4 sm:$0xff]   ;;  %v748_v5 = vld [vmem:[%s854_s25 + $0x24] ss:$8 sps:$4 sm:$0xff]   ;;  %v750_v6 = vld [vmem:[%s854_s25 + $0x20] ss:$8 sps:$4 sm:$0xff]  }
  0x12   : > { %428 = vmatpush1.bf16.msra.mxu0 %v744_v2  ;;  %v751_v7 = vld [vmem:[%s854_s25 + $0x34] ss:$8 sps:$4 sm:$0xff]   ;;  %v753_v8 = vld [vmem:[%s854_s25 + $0x30] ss:$8 sps:$4 sm:$0xff]   ;;  %v754_v9 = vld [vmem:[%s854_s25 + $0x44] ss:$8 sps:$4 sm:$0xff]  }
  0x13   : > { %429 = vmatprep.subr.bf16.mxu0 %v745_v3  ;;  %v756_v10 = vld [vmem:[%s854_s25 + $0x40] ss:$8 sps:$4 sm:$0xff]   ;;  %v757_v11 = vld [vmem:[%s854_s25 + $0x54] ss:$8 sps:$4 sm:$0xff]   ;;  %v759_v12 = vld [vmem:[%s854_s25 + $0x50] ss:$8 sps:$4 sm:$0xff]  }
  0x14   : > { %v760_v13 = vld [vmem:[%s854_s25 + $0x64] ss:$8 sps:$4 sm:$0xff]   ;;  %v762_v14 = vld [vmem:[%s854_s25 + $0x60] ss:$8 sps:$4 sm:$0xff]   ;;  %v763_v15 = vld [vmem:[%s854_s25 + $0x74] ss:$8 sps:$4 sm:$0xff]  }
  0x15   : > { %v765_v16 = vld [vmem:[%s854_s25 + $0x70] ss:$8 sps:$4 sm:$0xff]   ;;  %v766_v17 = vld [vmem:[%s854_s25 + $0x84] ss:$8 sps:$4 sm:$0xff]   ;;  %v768_v18 = vld [vmem:[%s854_s25 + $0x80] ss:$8 sps:$4 sm:$0xff]  }
  0x16   : > { %430 = vmatpush1.bf16.msra.mxu0 %v747_v4  ;;  %v769_v19 = vld [vmem:[%s854_s25 + $0x94] ss:$8 sps:$4 sm:$0xff]   ;;  %v771_v20 = vld [vmem:[%s854_s25 + $0x90] ss:$8 sps:$4 sm:$0xff]   ;;  %v772_v21 = vld [vmem:[%s854_s25 + $0xa4] ss:$8 sps:$4 sm:$0xff]  }
  0x17   : > { %431 = vmatprep.subr.bf16.mxu0 %v748_v5  ;;  %v774_v22 = vld [vmem:[%s854_s25 + $0xa0] ss:$8 sps:$4 sm:$0xff]   ;;  %v775_v23 = vld [vmem:[%s854_s25 + $0xb4] ss:$8 sps:$4 sm:$0xff]   ;;  %v777_v24 = vld [vmem:[%s854_s25 + $0xb0] ss:$8 sps:$4 sm:$0xff]  }
  0x18   : > { %v778_v25 = vld [vmem:[%s854_s25 + $0xc4] ss:$8 sps:$4 sm:$0xff]   ;;  %v780_v26 = vld [vmem:[%s854_s25 + $0xc0] ss:$8 sps:$4 sm:$0xff]   ;;  %v781_v27 = vld [vmem:[%s854_s25 + $0xd4] ss:$8 sps:$4 sm:$0xff]  }
  0x19   : > { %v783_v28 = vld [vmem:[%s854_s25 + $0xd0] ss:$8 sps:$4 sm:$0xff]   ;;  %v784_v29 = vld [vmem:[%s854_s25 + $0xe4] ss:$8 sps:$4 sm:$0xff]   ;;  %v786_v30 = vld [vmem:[%s854_s25 + $0xe0] ss:$8 sps:$4 sm:$0xff]  }
  0x1a   : > { %432 = vmatpush1.bf16.msra.mxu0 %v750_v6  ;;  %v787_v31 = vld [vmem:[%s854_s25 + $0xf4] ss:$8 sps:$4 sm:$0xff]   ;;  %v789_v32 = vld [vmem:[%s854_s25 + $0xf0] ss:$8 sps:$4 sm:$0xff]   ;;  %v507_v4 = vsub.s32 0, %v904_v0  ;;  %v511_v5 = vsub.s32 2, %v904_v0 }
  0x1b   : > { %433 = vmatprep.subr.bf16.mxu0 %v751_v7  ;;  %v503_v7 = vld [vmem:[%s924_s2] sm:$0xf] }
  0x1e   : > { %434 = vmatpush1.bf16.msra.mxu0 %v753_v8  ;;  %v529_v8 = vsub.s32 1, %v904_v0 }
  0x1f   : > { %435 = vmatprep.subr.bf16.mxu0 %v754_v9  ;;  %v533_v9 = vsub.s32 3, %v904_v0 }
  0x22   : > { %436 = vmatpush1.bf16.msra.mxu0 %v756_v10  ;;  %v508_v10 = vrot.slane %v503_v7, %v507_v4 }
  0x23   : > { %437 = vmatprep.subr.bf16.mxu0 %v757_v11  ;;  %v512_v11 = vrot.slane %v503_v7, %v511_v5 }
  0x26   : > { %438 = vmatpush1.bf16.msra.mxu0 %v759_v12  ;;  %v530_v12 = vrot.slane %v503_v7, %v529_v8 }
  0x27   : > { %439 = vmatprep.subr.bf16.mxu0 %v760_v13  ;;  %v534_v13 = vrot.slane %v503_v7, %v533_v9 }
  0x2a   : > { %440 = vmatpush1.bf16.msra.mxu0 %v762_v14  ;;  %v518_v14 = vrot.slane %v508_v10, %v507_v4 }
  0x2b   : > { %441 = vmatprep.subr.bf16.mxu0 %v763_v15  ;;  %v522_v15 = vrot.slane %v512_v11, %v507_v4 }
  0x2e   : > { %442 = vmatpush1.bf16.msra.mxu0 %v765_v16 }
  0x2f   : > { %443 = vmatprep.subr.bf16.mxu0 %v766_v17  ;;  %v540_v17 = vrot.slane %v530_v12, %v529_v8 }
  0x32   : > { %444 = vmatpush1.bf16.msra.mxu0 %v768_v18  ;;  %v544_v18 = vrot.slane %v534_v13, %v529_v8 }
  0x33   : > { %445 = vmatprep.subr.bf16.mxu0 %v769_v19 }
  0x36   : > { %446 = vmatpush1.bf16.msra.mxu0 %v771_v20 }
  0x37   : > { %447 = vmatprep.subr.bf16.mxu0 %v772_v21 }
  0x3a   : > { %448 = vmatpush1.bf16.msra.mxu0 %v774_v22 }
  0x3b   : > { %449 = vmatprep.subr.bf16.mxu0 %v775_v23 }
  0x3e   : > { %450 = vmatpush1.bf16.msra.mxu0 %v777_v24 }
  0x3f   : > { %451 = vmatprep.subr.bf16.mxu0 %v778_v25 }
  0x42   : > { %452 = vmatpush1.bf16.msra.mxu0 %v780_v26 }
  0x43   : > { %453 = vmatprep.subr.bf16.mxu0 %v781_v27 }
  0x46   : > { %454 = vmatpush1.bf16.msra.mxu0 %v783_v28 }
  0x47   : > { %455 = vmatprep.subr.bf16.mxu0 %v784_v29 }
  0x4a   : > { %456 = vmatpush1.bf16.msra.mxu0 %v786_v30 }
  0x4b   : > { %457 = vmatprep.subr.bf16.mxu0 %v787_v31 }
  0x4e   : > { %458 = vmatpush1.bf16.msra.mxu0 %v789_v32 }
  0x51   : > { %460 = vmatmul.mubr.bf16.vlgmr.msra.gmra.mrb[0].mxu0 %v790_v33 }
  0x86   : > { %v563_v59 = vpop.permute.xlu1 %562 }
  0x8a   : > { %v578_v60 = vpop.permute.xlu1 %577 }
 0x124   : > { %v461_v37 = vpop.f32.mrb[0].mxu0 }
 0x125   : > { %v463_v38 = vpop.f32.mrb[1].mxu0 }
 0x126   : > { %v465_v39 = vpop.f32.mrb[2].mxu0  ;;  %v470_v40 = vadd.f32 %v463_v38, %v461_v37 }
 0x127   : > { %v467_v41 = vpop.f32.mrb[3].mxu0 }
 0x128   : > { %v473_v42 = vadd.f32 %v467_v41, %v465_v39  ;;  %471 = vadd.xlane.f32.xlu0 %v470_v40 }
 0x12c   : > { %474 = vadd.xlane.f32.xlu0 %v473_v42 }
 0x142   : > { %557 = vperm.xlu0 %740, %v549_v43  }
 0x1b5   : > { %v472_v44 = vpop.xlane.xlu0 %471 }
 0x1b6   : > { %v477_v45 = vmul.f32 0.00390625, %v472_v44 }
 0x1b8   : > { %v479_v46 = vsub.f32 %v461_v37, %v477_v45  ;;  %v480_v47 = vsub.f32 %v463_v38, %v477_v45 }
 0x1b9   : > { %v475_v48 = vpop.xlane.xlu0 %474 }
 0x1ba   : > { %v478_v49 = vmul.f32 0.00390625, %v475_v48  ;;  %v483_v50 = vmul.f32 %v479_v46, %v479_v46  ;;  %v484_v51 = vmul.f32 %v480_v47, %v480_v47 }
 0x1bc   : > { %v481_v52 = vsub.f32 %v465_v39, %v478_v49  ;;  %v482_v53 = vsub.f32 %v467_v41, %v478_v49  ;;  %v487_v54 = vadd.f32 %v484_v51, %v483_v50 }
 0x1be   : > { %488 = vadd.xlane.f32.xlu1 %v487_v54  ;;  %v485_v55 = vmul.f32 %v481_v52, %v481_v52  ;;  %v486_v56 = vmul.f32 %v482_v53, %v482_v53  ;;  %v806_v54 = vmov 1966171168  }
 0x1c0   : > { %v490_v57 = vadd.f32 %v486_v56, %v485_v55  ;;  %v613_v55 = vunpack.c.l.s4 %v806_v54 }
 0x1c1   : > { %v558_v28 = vpop.permute.xlu0 %557 }
 0x1c2   : > { %491 = vadd.xlane.f32.xlu1 %v490_v57 }
 0x1d3   : > { %582 = vperm.xlu1 %741, %v574_v58  }
 0x24b   : > { %v489_v62 = vpop.xlane.xlu1 %488 }
 0x24c   : > { %v493_v63 = vmul.f32 0.00390625, %v489_v62  ;;  %v614_v62 = vunpack.c.0.s8 %v613_v55 }
 0x24e   : > { %v495_v1 = vadd.f32 1e-05, %v493_v63 }
 0x24f   : > { %v492_v2 = vpop.xlane.xlu1 %491 }
 0x250   : > { %793 = vrsqrt.f32 %v495_v1  ;;  %v494_v3 = vmul.f32 0.00390625, %v492_v2 }
 0x252   : > { %v496_v6 = vadd.f32 1e-05, %v494_v3  ;;  %v617_v3 = vsub.s32 %v614_v62, %v904_v0 }
 0x253   : > { %v583_v41 = vpop.permute.xlu1 %582 }
 0x254   : > { %795 = vrsqrt.f32 %v496_v6 }
 0x25a   : > { %v794_v16 = vpop.eup %793 }
 0x25b   : > { %v499_v19 = vmul.f32 %v794_v16, %v479_v46  ;;  %v500_v20 = vmul.f32 %v794_v16, %v480_v47 }
 0x25d   : > { %v523_v21 = vmul.f32 %v518_v14, %v499_v19  ;;  %v524_v22 = vmul.f32 %v522_v15, %v500_v20 }
 0x25e   : > { %v796_v23 = vpop.eup %795 }
 0x25f   : > { %v501_v24 = vmul.f32 %v796_v23, %v481_v52  ;;  %v502_v25 = vmul.f32 %v796_v23, %v482_v53  ;;  %v545_v26 = vadd.f32 %v540_v17, %v523_v21  ;;  %v546_v27 = vadd.f32 %v544_v18, %v524_v22 }
 0x261   : > { %v525_v29 = vmul.f32 %v518_v14, %v501_v24  ;;  %v526_v30 = vmul.f32 %v522_v15, %v502_v25  ;;  %vm551_vm0 = vcmp.ge.f32.partialorder %v545_v26, 0.0  ;;  %vm552_vm1 = vcmp.ge.f32.partialorder %v546_v27, 0.0 }
 0x262   : > { %v565_v31 = vmul.f32 %v558_v28, %v545_v26  ;;  %v566_v32 = vmul.f32 %v558_v28, %v546_v27 }
 0x263   : > { %v547_v33 = vadd.f32 %v540_v17, %v525_v29  ;;  %v548_v34 = vadd.f32 %v544_v18, %v526_v30 }
 0x264   : > { %v569_v35 = vsel %vm551_vm0, %v545_v26, %v565_v31  ;;  %v570_v36 = vsel %vm552_vm1, %v546_v27, %v566_v32 }
 0x265   : > { %vm553_vm2 = vcmp.ge.f32.partialorder %v547_v33, 0.0  ;;  %vm554_vm3 = vcmp.ge.f32.partialorder %v548_v34, 0.0  ;;  %v567_v37 = vmul.f32 %v563_v59, %v547_v33  ;;  %v568_v38 = vmul.f32 %v563_v59, %v548_v34 }
 0x266   : > { %v585_v44 = vmul.f32 %v578_v60, %v569_v35  ;;  %v586_v45 = vmul.f32 %v578_v60, %v570_v36 }
 0x267   : > { %v571_v39 = vsel %vm553_vm2, %v547_v33, %v567_v37  ;;  %v572_v40 = vsel %vm554_vm3, %v548_v34, %v568_v38 }
 0x268   : > { %v587_v42 = vmul.f32 %v583_v41, %v571_v39  ;;  %v588_v43 = vmul.f32 %v583_v41, %v572_v40 }
 0x26a   : > { %v589_v46 = vadd.f32 %v587_v42, %v585_v44  ;;  %v596_v47 = vadd.f32 %v588_v43, %v586_v45 }
 0x26c   : > { %v590_v48 = vrot.slane %v589_v46, 4  ;;  %v597_v49 = vrot.slane %v596_v47, 4 }
 0x26e   : > { %v591_v50 = vadd.f32 %v590_v48, %v589_v46  ;;  %v598_v51 = vadd.f32 %v597_v49, %v596_v47 }
 0x270   : > { %v592_v52 = vrot.slane %v591_v50, 2  ;;  %v599_v53 = vrot.slane %v598_v51, 2 }
 0x272   : > { %v593_v56 = vadd.f32 %v592_v52, %v591_v50  ;;  %v600_v57 = vadd.f32 %v599_v53, %v598_v51 }
 0x274   : > { %v594_v58 = vrot.slane %v593_v56, 1  ;;  %v601_v59 = vrot.slane %v600_v57, 1 }
 0x276   : > { %v595_v63 = vadd.f32 %v594_v58, %v593_v56  ;;  %v602_v1 = vadd.f32 %v601_v59, %v600_v57 }
 0x278   : > { %vm603_vm4 = vcmp.ge.f32.partialorder %v595_v63, 0.0  ;;  %vm604_vm5 = vcmp.ge.f32.partialorder %v602_v1, 0.0  ;;  %v605_v60 = vmul.f32 0.5, %v595_v63  ;;  %v606_v2 = vmul.f32 0.5, %v602_v1 }
 0x27a   : > { %v607_v4 = vsel %vm603_vm4, %v595_v63, %v605_v60  ;;  %v608_v5 = vsel %vm604_vm5, %v602_v1, %v606_v2 }
 0x27b   : > { %v611_v6 = vcombine.low %v607_v4, %v608_v5 }
 0x27d   : > { %v618_v7 = vrot.slane %v611_v6, %v617_v3 }
 0x27f   : > { %v625_v8 = vrot.slane %v618_v7, %v617_v3 }
 0x281   : > { %631 = vst.msk [vmem:[%s222_s16] sm:$0x3] %vm629_vm6, %v625_v8 }
 0x282 PF: > { %s15_s18 = sadd.s32 1, %s803_s18  }
 0x283   : > { %p12_p4 = scmp.ge.s32.totalorder %s15_s18, 4  }
 0x285   :  { %14 = sbr.rel (!%p12_p4) target bundleno = 1 (0x1), region = 70 }

</bundles_post_ra>
